<compile_context>
chip_gen: v7x
topology: tpu7x:2x2x1
jax: 0.10.0
libtpu: 0.0.40
codegen_flags: <defaults>
</compile_context>

<pallas_src>
import jax
import jax.numpy as jnp
from jax.experimental import pallas as pl
from jax.experimental.pallas import tpu as pltpu

IN_DIM = 6
HIDDEN = 256
OUT_DIM = 6
OUT_PAD = 128  # lane-dense padded width for the final layer / output


def _softplus(x):
    # numerically stable softplus == log(1 + exp(x)) == logaddexp(x, 0)
    return jnp.logaddexp(x, 0.0)


def _round_up(x, m):
    return ((x + m - 1) // m) * m


def conditional_model_kernel(
    y_ref,    # [TB, 1]        int32 timesteps for this batch tile
    x_ref,    # [TB, 6]        f32
    e1_ref,   # [n_steps, 256] f32   (resident)
    e2_ref,   # [n_steps, 256] f32   (resident)
    w1_ref,   # [6, 256]       bf16  (resident)
    b1_ref,   # [1, 256]       f32   (resident)
    w2_ref,   # [256, 256]     bf16  (resident)
    b2_ref,   # [1, 256]       f32   (resident)
    w3_ref,   # [256, 128]     bf16  (zero-padded from [256, 6], resident)
    b3_ref,   # [1, 128]       f32   (zero-padded, resident)
    o_ref,    # [TB, 128]      f32
):
    tb = y_ref.shape[0]
    n_steps = e1_ref.shape[0]

    # In-kernel embedding gather: one_hot(y) @ embed on the MXU.
    # one_hot entries are exactly 0/1 and the tables stay f32, so gamma is
    # bit-exact vs. a row gather.
    steps = jax.lax.broadcasted_iota(jnp.int32, (tb, n_steps), 1)
    onehot = (y_ref[...] == steps).astype(jnp.float32)           # [TB, n_steps]
    g1 = jnp.dot(onehot, e1_ref[...], preferred_element_type=jnp.float32)
    g2 = jnp.dot(onehot, e2_ref[...], preferred_element_type=jnp.float32)

    # ConditionalLinear 1: Linear(6, 256), gate with embedding, softplus.
    x = x_ref[...].astype(jnp.bfloat16)
    h1 = jnp.dot(x, w1_ref[...], preferred_element_type=jnp.float32) + b1_ref[...]
    h1 = _softplus(g1 * h1)

    # ConditionalLinear 2: Linear(256, 256), gate with embedding, softplus.
    h2 = jnp.dot(h1.astype(jnp.bfloat16), w2_ref[...],
                 preferred_element_type=jnp.float32) + b2_ref[...]
    h2 = _softplus(g2 * h2)

    # Final Linear(256, 6), lane-dense padded to 128 output lanes.
    o_ref[...] = jnp.dot(h2.astype(jnp.bfloat16), w3_ref[...],
                         preferred_element_type=jnp.float32) + b3_ref[...]


def conditional_model_forward(x, y, params, tile_b=256):
    """x: [B, 6] float32, y: [B] int timesteps."""
    B = x.shape[0]
    n_steps = params["embed1"].shape[0]

    # Batch tile: multiple of 8 sublanes, capped at 256 rows.
    TB = min(tile_b, _round_up(max(B, 8), 8))
    Bp = _round_up(B, TB)

    # Pad batch (pad rows use timestep 0 / zero inputs; sliced off below).
    xp = jnp.zeros((Bp, IN_DIM), jnp.float32).at[:B].set(x.astype(jnp.float32))
    yp = jnp.zeros((Bp, 1), jnp.int32).at[:B, 0].set(y.astype(jnp.int32))

    # bf16 matmul operands (f32 accumulation inside the kernel);
    # zero-pad final layer to 128 lanes for unmasked, lane-dense stores.
    w1 = params["w1"].astype(jnp.bfloat16)
    w2 = params["w2"].astype(jnp.bfloat16)
    w3p = jnp.zeros((HIDDEN, OUT_PAD), jnp.bfloat16).at[:, :OUT_DIM].set(
        params["w3"].astype(jnp.bfloat16))
    b3p = jnp.zeros((1, OUT_PAD), jnp.float32).at[:, :OUT_DIM].set(
        params["b3"].astype(jnp.float32))

    grid = (Bp // TB,)
    resident = lambda shape: pl.BlockSpec(shape, lambda i: (0, 0))
    tiled = lambda shape: pl.BlockSpec(shape, lambda i: (i, 0))

    out_pad = pl.pallas_call(
        conditional_model_kernel,
        out_shape=jax.ShapeDtypeStruct((Bp, OUT_PAD), jnp.float32),
        grid_spec=pltpu.PrefetchScalarGridSpec(
            num_scalar_prefetch=0,
            grid=grid,
            in_specs=[
                tiled((TB, 1)),                  # y
                tiled((TB, IN_DIM)),             # x
                resident((n_steps, HIDDEN)),     # embed1
                resident((n_steps, HIDDEN)),     # embed2
                resident((IN_DIM, HIDDEN)),      # w1
                resident((1, HIDDEN)),           # b1
                resident((HIDDEN, HIDDEN)),      # w2
                resident((1, HIDDEN)),           # b2
                resident((HIDDEN, OUT_PAD)),     # w3 (padded)
                resident((1, OUT_PAD)),          # b3 (padded)
            ],
            out_specs=tiled((TB, OUT_PAD)),
        ),
        compiler_params=pltpu.CompilerParams(
            dimension_semantics=("parallel",),   # shard batch tiles across TCs (v7x)
            vmem_limit_bytes=32 * 1024 * 1024,
        ),
    )(
        yp, xp,
        params["embed1"].astype(jnp.float32),
        params["embed2"].astype(jnp.float32),
        w1, params["b1"].astype(jnp.float32),
        w2, params["b2"].astype(jnp.float32),
        w3p, b3p,
    )
    return out_pad[:B, :OUT_DIM]


def init_params(key, n_steps):
    """Deterministic init mimicking the PyTorch module's __init__ shapes (f32)."""
    ks = jax.random.split(key, 8)

    def linear(kw, kb, fan_in, fan_out):
        bound = 1.0 / jnp.sqrt(float(fan_in))
        w = jax.random.uniform(kw, (fan_in, fan_out), jnp.float32, -bound, bound)
        b = jax.random.uniform(kb, (1, fan_out), jnp.float32, -bound, bound)
        return w, b

    w1, b1 = linear(ks[0], ks[1], IN_DIM, HIDDEN)
    w2, b2 = linear(ks[2], ks[3], HIDDEN, HIDDEN)
    w3, b3 = linear(ks[4], ks[5], HIDDEN, OUT_DIM)
    # embedding.weight.data.uniform_()  -> U[0, 1)
    embed1 = jax.random.uniform(ks[6], (n_steps, HIDDEN), jnp.float32, 0.0, 1.0)
    embed2 = jax.random.uniform(ks[7], (n_steps, HIDDEN), jnp.float32, 0.0, 1.0)
    return dict(w1=w1, b1=b1, w2=w2, b2=b2, w3=w3, b3=b3,
                embed1=embed1, embed2=embed2)


def reference_forward(x, y, params):
    """Pure-JAX f32 reference matching the PyTorch semantics."""
    g1 = jnp.take(params["embed1"], y, axis=0)
    g2 = jnp.take(params["embed2"], y, axis=0)
    h1 = jax.nn.softplus(g1 * (x @ params["w1"] + params["b1"]))
    h2 = jax.nn.softplus(g2 * (h1 @ params["w2"] + params["b2"]))
    return h2 @ params["w3"] + params["b3"]


if __name__ == "__main__":
    n_steps = 50
    B = 8

    key = jax.random.PRNGKey(0)
    k_params, k_x, k_y = jax.random.split(key, 3)

    params = init_params(k_params, n_steps)
    x = jax.random.normal(k_x, (B, IN_DIM), jnp.float32)
    y = jax.random.randint(k_y, (B,), 0, n_steps, dtype=jnp.int32)

    out = conditional_model_forward(x, y, params)
    out = jax.block_until_ready(out)

    ref = reference_forward(x, y, params)
    assert out.shape == (B, OUT_DIM)
    # Tolerance loosened vs the pure-f32 reference because matmul operands run
    # in bf16 (accumulation stays f32).
    assert jnp.allclose(out, ref, atol=2e-2, rtol=2e-2), "mismatch vs reference"

    print("KERNEL_OK")
</pallas_src>

<mosaic_0001>
module attributes {stable_mosaic.version = 11 : i64} {
  func.func @conditional_model_kernel(%arg0: i32, %arg1: memref<8x1xi32, #tpu.memory_space<vmem>>, %arg2: memref<8x6xf32, #tpu.memory_space<vmem>>, %arg3: memref<50x256xf32, #tpu.memory_space<vmem>>, %arg4: memref<50x256xf32, #tpu.memory_space<vmem>>, %arg5: memref<6x256xbf16, #tpu.memory_space<vmem>>, %arg6: memref<1x256xf32, #tpu.memory_space<vmem>>, %arg7: memref<256x256xbf16, #tpu.memory_space<vmem>>, %arg8: memref<1x256xf32, #tpu.memory_space<vmem>>, %arg9: memref<256x128xbf16, #tpu.memory_space<vmem>>, %arg10: memref<1x128xf32, #tpu.memory_space<vmem>>, %arg11: memref<8x128xf32, #tpu.memory_space<vmem>>) attributes {dimension_semantics = [#tpu.dimension_semantics<parallel>], iteration_bounds = array<i64: 1>, scalar_prefetch = 0 : i64, scratch_operands = 0 : i64, tpu.core_type = #tpu.core_type<tc>, window_params = [{transform_indices = @transform_0, window_bounds = array<i64: 8, 1>}, {transform_indices = @transform_1, window_bounds = array<i64: 8, 6>}, {pipeline_mode = #tpu.pipeline_mode<synchronous>, transform_indices = @transform_2, window_bounds = array<i64: 50, 256>}, {pipeline_mode = #tpu.pipeline_mode<synchronous>, transform_indices = @transform_3, window_bounds = array<i64: 50, 256>}, {pipeline_mode = #tpu.pipeline_mode<synchronous>, transform_indices = @transform_4, window_bounds = array<i64: 6, 256>}, {pipeline_mode = #tpu.pipeline_mode<synchronous>, transform_indices = @transform_5, window_bounds = array<i64: 1, 256>}, {pipeline_mode = #tpu.pipeline_mode<synchronous>, transform_indices = @transform_6, window_bounds = array<i64: 256, 256>}, {pipeline_mode = #tpu.pipeline_mode<synchronous>, transform_indices = @transform_7, window_bounds = array<i64: 1, 256>}, {pipeline_mode = #tpu.pipeline_mode<synchronous>, transform_indices = @transform_8, window_bounds = array<i64: 256, 128>}, {pipeline_mode = #tpu.pipeline_mode<synchronous>, transform_indices = @transform_9, window_bounds = array<i64: 1, 128>}, {transform_indices = @transform_10, window_bounds = array<i64: 8, 128>}]} {
    %0 = tpu.iota {dimensions = array<i32: 1>} : vector<8x50xi32>
    %c0 = arith.constant 0 : index
    %c0_0 = arith.constant 0 : index
    %1 = vector.load %arg1[%c0, %c0_0] : memref<8x1xi32, #tpu.memory_space<vmem>>, vector<8x1xi32>
    %2 = vector.broadcast %1 : vector<8x1xi32> to vector<8x50xi32>
    %3 = arith.cmpi eq, %2, %0 : vector<8x50xi32>
    %4 = arith.extui %3 : vector<8x50xi1> to vector<8x50xi32>
    %5 = arith.sitofp %4 : vector<8x50xi32> to vector<8x50xf32>
    %c0_1 = arith.constant 0 : index
    %c0_2 = arith.constant 0 : index
    %6 = vector.load %arg3[%c0_1, %c0_2] : memref<50x256xf32, #tpu.memory_space<vmem>>, vector<50x256xf32>
    %cst = arith.constant dense<0.000000e+00> : vector<8x256xf32>
    %7 = tpu.matmul %5, %6, %cst {dimension_numbers = #tpu.dot_dimension_numbers<[1], [0], [0], [1], [0, 0, 1, 1], [], []>} : vector<8x50xf32>, vector<50x256xf32>, vector<8x256xf32> -> vector<8x256xf32>
    %c0_3 = arith.constant 0 : index
    %c0_4 = arith.constant 0 : index
    %8 = vector.load %arg4[%c0_3, %c0_4] : memref<50x256xf32, #tpu.memory_space<vmem>>, vector<50x256xf32>
    %cst_5 = arith.constant dense<0.000000e+00> : vector<8x256xf32>
    %9 = tpu.matmul %5, %8, %cst_5 {dimension_numbers = #tpu.dot_dimension_numbers<[1], [0], [0], [1], [0, 0, 1, 1], [], []>} : vector<8x50xf32>, vector<50x256xf32>, vector<8x256xf32> -> vector<8x256xf32>
    %c0_6 = arith.constant 0 : index
    %c0_7 = arith.constant 0 : index
    %10 = vector.load %arg2[%c0_6, %c0_7] : memref<8x6xf32, #tpu.memory_space<vmem>>, vector<8x6xf32>
    %11 = arith.truncf %10 : vector<8x6xf32> to vector<8x6xbf16>
    %c0_8 = arith.constant 0 : index
    %c0_9 = arith.constant 0 : index
    %12 = vector.load %arg5[%c0_8, %c0_9] : memref<6x256xbf16, #tpu.memory_space<vmem>>, vector<6x256xbf16>
    %cst_10 = arith.constant dense<0.000000e+00> : vector<8x256xf32>
    %13 = tpu.matmul %11, %12, %cst_10 {dimension_numbers = #tpu.dot_dimension_numbers<[1], [0], [0], [1], [0, 0, 1, 1], [], []>} : vector<8x6xbf16>, vector<6x256xbf16>, vector<8x256xf32> -> vector<8x256xf32>
    %c0_11 = arith.constant 0 : index
    %c0_12 = arith.constant 0 : index
    %14 = vector.load %arg6[%c0_11, %c0_12] : memref<1x256xf32, #tpu.memory_space<vmem>>, vector<1x256xf32>
    %15 = vector.broadcast %14 : vector<1x256xf32> to vector<8x256xf32>
    %16 = arith.addf %13, %15 : vector<8x256xf32>
    %17 = arith.mulf %7, %16 : vector<8x256xf32>
    %cst_13 = arith.constant 0.000000e+00 : f32
    %18 = vector.broadcast %cst_13 : f32 to vector<8x256xf32>
    %19 = arith.maximumf %17, %18 : vector<8x256xf32>
    %20 = vector.broadcast %cst_13 : f32 to vector<8x256xf32>
    %21 = arith.subf %17, %20 : vector<8x256xf32>
    %22 = arith.cmpf one, %21, %21 : vector<8x256xf32>
    %23 = vector.broadcast %cst_13 : f32 to vector<8x256xf32>
    %24 = arith.addf %17, %23 : vector<8x256xf32>
    %25 = math.absf %21 : vector<8x256xf32>
    %cst_14 = arith.constant 0.000000e+00 : f32
    %26 = vector.broadcast %cst_14 : f32 to vector<8x256xf32>
    %27 = arith.subf %26, %25 : vector<8x256xf32>
    %28 = math.exp %27 : vector<8x256xf32>
    %29 = math.log1p %28 : vector<8x256xf32>
    %30 = arith.addf %19, %29 : vector<8x256xf32>
    %31 = arith.select %22, %24, %30 : vector<8x256xi1>, vector<8x256xf32>
    %32 = arith.truncf %31 : vector<8x256xf32> to vector<8x256xbf16>
    %c0_15 = arith.constant 0 : index
    %c0_16 = arith.constant 0 : index
    %33 = vector.load %arg7[%c0_15, %c0_16] : memref<256x256xbf16, #tpu.memory_space<vmem>>, vector<256x256xbf16>
    %cst_17 = arith.constant dense<0.000000e+00> : vector<8x256xf32>
    %34 = tpu.matmul %32, %33, %cst_17 {dimension_numbers = #tpu.dot_dimension_numbers<[1], [0], [0], [1], [0, 0, 1, 1], [], []>} : vector<8x256xbf16>, vector<256x256xbf16>, vector<8x256xf32> -> vector<8x256xf32>
    %c0_18 = arith.constant 0 : index
    %c0_19 = arith.constant 0 : index
    %35 = vector.load %arg8[%c0_18, %c0_19] : memref<1x256xf32, #tpu.memory_space<vmem>>, vector<1x256xf32>
    %36 = vector.broadcast %35 : vector<1x256xf32> to vector<8x256xf32>
    %37 = arith.addf %34, %36 : vector<8x256xf32>
    %38 = arith.mulf %9, %37 : vector<8x256xf32>
    %cst_20 = arith.constant 0.000000e+00 : f32
    %39 = vector.broadcast %cst_20 : f32 to vector<8x256xf32>
    %40 = arith.maximumf %38, %39 : vector<8x256xf32>
    %41 = vector.broadcast %cst_20 : f32 to vector<8x256xf32>
    %42 = arith.subf %38, %41 : vector<8x256xf32>
    %43 = arith.cmpf one, %42, %42 : vector<8x256xf32>
    %44 = vector.broadcast %cst_20 : f32 to vector<8x256xf32>
    %45 = arith.addf %38, %44 : vector<8x256xf32>
    %46 = math.absf %42 : vector<8x256xf32>
    %cst_21 = arith.constant 0.000000e+00 : f32
    %47 = vector.broadcast %cst_21 : f32 to vector<8x256xf32>
    %48 = arith.subf %47, %46 : vector<8x256xf32>
    %49 = math.exp %48 : vector<8x256xf32>
    %50 = math.log1p %49 : vector<8x256xf32>
    %51 = arith.addf %40, %50 : vector<8x256xf32>
    %52 = arith.select %43, %45, %51 : vector<8x256xi1>, vector<8x256xf32>
    %53 = arith.truncf %52 : vector<8x256xf32> to vector<8x256xbf16>
    %c0_22 = arith.constant 0 : index
    %c0_23 = arith.constant 0 : index
    %54 = vector.load %arg9[%c0_22, %c0_23] : memref<256x128xbf16, #tpu.memory_space<vmem>>, vector<256x128xbf16>
    %cst_24 = arith.constant dense<0.000000e+00> : vector<8x128xf32>
    %55 = tpu.matmul %53, %54, %cst_24 {dimension_numbers = #tpu.dot_dimension_numbers<[1], [0], [0], [1], [0, 0, 1, 1], [], []>} : vector<8x256xbf16>, vector<256x128xbf16>, vector<8x128xf32> -> vector<8x128xf32>
    %c0_25 = arith.constant 0 : index
    %c0_26 = arith.constant 0 : index
    %56 = vector.load %arg10[%c0_25, %c0_26] : memref<1x128xf32, #tpu.memory_space<vmem>>, vector<1x128xf32>
    %57 = vector.broadcast %56 : vector<1x128xf32> to vector<8x128xf32>
    %58 = arith.addf %55, %57 : vector<8x128xf32>
    %c0_27 = arith.constant 0 : index
    %c0_28 = arith.constant 0 : index
    %59 = vector.load %arg11[%c0_27, %c0_28] : memref<8x128xf32, #tpu.memory_space<vmem>>, vector<8x128xf32>
    tpu.vector_store %arg11[%c0_27, %c0_28], %58 {strides = array<i32>} : memref<8x128xf32, #tpu.memory_space<vmem>>, vector<8x128xf32>,
    return
  }
  func.func @transform_0(%arg0: i32) -> (i32, i32) {
    %c0_i32 = arith.constant 0 : i32
    %c0_i32_0 = arith.constant 0 : i32
    return %arg0, %c0_i32 : i32, i32
  }
  func.func @transform_1(%arg0: i32) -> (i32, i32) {
    %c0_i32 = arith.constant 0 : i32
    %c0_i32_0 = arith.constant 0 : i32
    return %arg0, %c0_i32 : i32, i32
  }
  func.func @transform_2(%arg0: i32) -> (i32, i32) {
    %c0_i32 = arith.constant 0 : i32
    %c0_i32_0 = arith.constant 0 : i32
    %c0_i32_1 = arith.constant 0 : i32
    return %c0_i32, %c0_i32_0 : i32, i32
  }
  func.func @transform_3(%arg0: i32) -> (i32, i32) {
    %c0_i32 = arith.constant 0 : i32
    %c0_i32_0 = arith.constant 0 : i32
    %c0_i32_1 = arith.constant 0 : i32
    return %c0_i32, %c0_i32_0 : i32, i32
  }
  func.func @transform_4(%arg0: i32) -> (i32, i32) {
    %c0_i32 = arith.constant 0 : i32
    %c0_i32_0 = arith.constant 0 : i32
    %c0_i32_1 = arith.constant 0 : i32
    return %c0_i32, %c0_i32_0 : i32, i32
  }
  func.func @transform_5(%arg0: i32) -> (i32, i32) {
    %c0_i32 = arith.constant 0 : i32
    %c0_i32_0 = arith.constant 0 : i32
    %c0_i32_1 = arith.constant 0 : i32
    return %c0_i32, %c0_i32_0 : i32, i32
  }
  func.func @transform_6(%arg0: i32) -> (i32, i32) {
    %c0_i32 = arith.constant 0 : i32
    %c0_i32_0 = arith.constant 0 : i32
    %c0_i32_1 = arith.constant 0 : i32
    return %c0_i32, %c0_i32_0 : i32, i32
  }
  func.func @transform_7(%arg0: i32) -> (i32, i32) {
    %c0_i32 = arith.constant 0 : i32
    %c0_i32_0 = arith.constant 0 : i32
    %c0_i32_1 = arith.constant 0 : i32
    return %c0_i32, %c0_i32_0 : i32, i32
  }
  func.func @transform_8(%arg0: i32) -> (i32, i32) {
    %c0_i32 = arith.constant 0 : i32
    %c0_i32_0 = arith.constant 0 : i32
    %c0_i32_1 = arith.constant 0 : i32
    return %c0_i32, %c0_i32_0 : i32, i32
  }
  func.func @transform_9(%arg0: i32) -> (i32, i32) {
    %c0_i32 = arith.constant 0 : i32
    %c0_i32_0 = arith.constant 0 : i32
    %c0_i32_1 = arith.constant 0 : i32
    return %c0_i32, %c0_i32_0 : i32, i32
  }
  func.func @transform_10(%arg0: i32) -> (i32, i32) {
    %c0_i32 = arith.constant 0 : i32
    %c0_i32_0 = arith.constant 0 : i32
    return %arg0, %c0_i32 : i32, i32
  }
}

</mosaic_0001>

<bundles_post_ra>
// kernel: tpu_custom_call.1
= control target key start
LH: loop header
LB: loop body
LE: loop exit
PB: predicated region body
PF: predicated region fallthrough
CT: control target
= control target key end

     0   :  { %15 = vsyncpa [#allocation3], 0  ;;  %s1379_s0 = inlined_call_operand.vmem [shape: s32[8,1], index: 0, kind: input, shape index: {}]   ;;  %s1380_s1 = inlined_call_operand.vmem [shape: f32[8,6], index: 1, kind: input, shape index: {}]   ;;  %s1381_s2 = inlined_call_operand.hbm [shape: f32[50,256], index: 2, kind: input, shape index: {}]   ;;  %s1382_s3 = inlined_call_operand.hbm [shape: f32[50,256], index: 3, kind: input, shape index: {}]   ;;  %s1383_s4 = inlined_call_operand.vmem [shape: bf16[6,256], index: 4, kind: input, shape index: {}]   ;;  %s1384_s5 = inlined_call_operand.vmem [shape: f32[1,256], index: 5, kind: input, shape index: {}]   ;;  %s1385_s6 = inlined_call_operand.hbm [shape: bf16[256,256], index: 6, kind: input, shape index: {}]   ;;  %s1386_s7 = inlined_call_operand.vmem [shape: f32[1,256], index: 7, kind: input, shape index: {}]   ;;  %s1387_s8 = inlined_call_operand.hbm [shape: bf16[256,128], index: 8, kind: input, shape index: {}]   ;;  %s1388_s9 = inlined_call_operand.vmem [shape: f32[1,128], index: 9, kind: input, shape index: {}]   ;;  %s1389_s10 = inlined_call_operand.hbm [shape: f32[8,128], index: 10, kind: output, shape index: {}]  }
   0x1   :  { %16 = vsyncpa [#allocation6], 0 }
   0x2   :  { %17 = vsyncpa [#allocation9], 0 }
   0x3   :  { %18 = vsyncpa [#allocation4], 0  ;;  %s1198_s13 = smov [#allocation5]   ;;  %s1199_s15 = smov [#allocation2]  }
   0x4   :  { %s40_s14 = sshll.u32 %s1198_s13, 4  ;;  %s28_s16 = sshll.u32 %s1199_s15, 4  ;;  %s41_s14 = int_to_ptr.vmem [resolvable:$true] %s40_s14  ;;  %s1266_s16 = int_to_ptr.vmem [resolvable:$true] %s28_s16 }
   0x5   :  { %s1080_s19 = scalar_lea.hbm %s1382_s3, 1792 }
   0x6   :  { %p1081_p0 = scmp.ne.s32.totalorder %s1382_s3, %s1080_s19  ;;  %p1084_p1 = scmp.lt.u32.totalorder %s1080_s19, %s1382_s3 }
   0x8   :  { %p1086_p2 = pnand %p1084_p1, %p1081_p0 }
   0xa   :  { %1089 = shalt.err (!%p1086_p2)
}
   0xb   :  { %s1090_s24 = scalar_lea.vmem %s41_s14, 1792  ;;  %p1095_p4 = scmp.lt.s32.totalorder %s41_s14, %s41_s14 }
   0xc   :  { %p1091_p3 = scmp.ne.s32.totalorder %s41_s14, %s1090_s24  ;;  %p1096_p5 = scmp.lt.s32.totalorder %s1090_s24, %s1090_s24 }
   0xe   :  { %p1097_p6 = por %p1096_p5, %p1095_p4 }
  0x10   :  { %p1098_p7 = pnand %p1097_p6, %p1091_p3 }
  0x12   :  { %1101 = shalt.err (!%p1098_p7)
}
  0x13   :  { %s1200_s25 = smov 256   ;;  %s1201_s26 = smov 16  }
  0x14   :  { %46 = dma.hbm_to_vmem [thread:$0]  %s1382_s3, 1792, %s41_s14, [#allocation6], %s1200_s25, %s1200_s25, %s1201_s26  }
  0x15   :  { %s1102_s11 = scalar_lea.hbm %s1381_s2, 1792 }
  0x16   :  { %p1103_p8 = scmp.ne.s32.totalorder %s1381_s2, %s1102_s11  ;;  %p1106_p9 = scmp.lt.u32.totalorder %s1102_s11, %s1381_s2 }
  0x18   :  { %p1108_p10 = pnand %p1106_p9, %p1103_p8 }
  0x1a   :  { %1111 = shalt.err (!%p1108_p10)
}
  0x1b   :  { %s1112_s18 = scalar_lea.vmem %s1266_s16, 1792  ;;  %p1117_p12 = scmp.lt.s32.totalorder %s1266_s16, %s1266_s16 }
  0x1c   :  { %p1113_p11 = scmp.ne.s32.totalorder %s1266_s16, %s1112_s18  ;;  %p1118_p13 = scmp.lt.s32.totalorder %s1112_s18, %s1112_s18 }
  0x1e   :  { %p1119_p0 = por %p1118_p13, %p1117_p12 }
  0x20   :  { %p1120_p1 = pnand %p1119_p0, %p1113_p11 }
  0x22   :  { %1123 = shalt.err (!%p1120_p1)
}
  0x23   :  { %34 = dma.hbm_to_vmem [thread:$0]  %s1381_s2, 1792, %s1266_s16, [#allocation3], %s1200_s25, %s1200_s25, %s1201_s26  }
  0x24   :  { %s1202_s19 = smov [#allocation7]   ;;  %s1124_s23 = scalar_lea.hbm %s1385_s6, 4096 }
  0x25   :  { %s56_s20 = sshll.u32 %s1202_s19, 4  ;;  %p1125_p2 = scmp.ne.s32.totalorder %s1385_s6, %s1124_s23  ;;  %s57_s20 = int_to_ptr.vmem [resolvable:$true] %s56_s20 }
  0x26   :  { %p1128_p3 = scmp.lt.u32.totalorder %s1124_s23, %s1385_s6 }
  0x28   :  { %p1130_p4 = pnand %p1128_p3, %p1125_p2 }
  0x2a   :  { %1133 = shalt.err (!%p1130_p4)
}
  0x2b   :  { %s1134_s30 = scalar_lea.vmem %s57_s20, 4096  ;;  %p1139_p6 = scmp.lt.s32.totalorder %s57_s20, %s57_s20 }
  0x2c   :  { %p1135_p5 = scmp.ne.s32.totalorder %s57_s20, %s1134_s30  ;;  %p1140_p7 = scmp.lt.s32.totalorder %s1134_s30, %s1134_s30 }
  0x2e   :  { %p1141_p8 = por %p1140_p7, %p1139_p6 }
  0x30   :  { %p1142_p9 = pnand %p1141_p8, %p1135_p5 }
  0x32   :  { %1145 = shalt.err (!%p1142_p9)
}
  0x33   :  { %s1203_s2 = smov 128   ;;  %s1204_s16 = smov 8  }
  0x34   :  { %62 = dma.hbm_to_vmem [thread:$0]  %s1385_s6, 4096, %s57_s20, [#allocation6], %s1203_s2, %s1203_s2, %s1204_s16  }
  0x35   :  { %s1205_s11 = smov [#allocation8]   ;;  %s1146_s17 = scalar_lea.hbm %s1387_s8, 2048 }
  0x36   :  { %s70_s12 = sshll.u32 %s1205_s11, 4  ;;  %p1147_p10 = scmp.ne.s32.totalorder %s1387_s8, %s1146_s17  ;;  %s71_s12 = int_to_ptr.vmem [resolvable:$true] %s70_s12 }
  0x37   :  { %p1150_p11 = scmp.lt.u32.totalorder %s1146_s17, %s1387_s8 }
  0x39   :  { %p1152_p12 = pnand %p1150_p11, %p1147_p10 }
  0x3b   :  { %1155 = shalt.err (!%p1152_p12)
}
  0x3c   :  { %s1156_s21 = scalar_lea.vmem %s71_s12, 2048  ;;  %p1161_p0 = scmp.lt.s32.totalorder %s71_s12, %s71_s12 }
  0x3d   :  { %p1157_p13 = scmp.ne.s32.totalorder %s71_s12, %s1156_s21  ;;  %p1162_p1 = scmp.lt.s32.totalorder %s1156_s21, %s1156_s21 }
  0x3f   :  { %p1163_p2 = por %p1162_p1, %p1161_p0 }
  0x41   :  { %p1164_p3 = pnand %p1163_p2, %p1157_p13 }
  0x43   :  { %1167 = shalt.err (!%p1164_p3)
}
  0x44   :  { %s1206_s6 = smov 64   ;;  %s1207_s20 = smov 4  }
  0x45   :  { %76 = dma.hbm_to_vmem [thread:$0]  %s1387_s8, 2048, %s71_s12, [#allocation9], %s1206_s6, %s1206_s6, %s1207_s20  }
  0x46   :  { %1190 = dma.done.wait [#allocation3], 1792  }
  0x47   :  { %1191 = vsyncadd [#allocation3], 4294965504 }
  0x48   :  { %1192 = dma.done.wait [#allocation6], 5888  }
  0x49   :  { %1193 = vsyncadd [#allocation6], 4294961408 }
  0x4a   :  { %1194 = dma.done.wait [#allocation9], 2048  }
  0x4b   :  { %1195 = vsyncadd [#allocation9], 4294965248  ;;  %v1208_v0 = vmov 0   ;;  %v1209_v1 = vmov 0.0   ;;  %v94_v2 = vld [vmem:[%s1379_s0] sm:$0xff]  ;;  %v102_v3 = vld [vmem:[#allocation2 + $0x8] sm:$0xff]  ;;  %v92_v28 = vlaneseq }
  0x4c   :  { %997 = vset.pattern.permute.xlu0 %v1208_v0  ;;  %190 = vmatprep.mubr.f32.mxu0 %v1209_v1  ;;  %v104_v4 = vld [vmem:[#allocation2 + $0x18] sm:$0xff]  ;;  %v101_v6 = vld [vmem:[#allocation2] sm:$0xff]  ;;  %v103_v7 = vld [vmem:[#allocation2 + $0x10] sm:$0xff]  ;;  %vm119_vm0 = vcmask 1041408   ;;  %vm115_vm1 = vcmask 408576   ;;  %vm312_vm3 = vcmask 1042432  }
  0x4d   :  { %96 = vperm.xlu0 %997, %v94_v2   ;;  %v960_v5 = vpack.c.bf16 %v104_v4, %v102_v3  ;;  %v106_v8 = vld [vmem:[#allocation2 + $0x28] sm:$0xff]  ;;  %v962_v9 = vpack.c.bf16 %v103_v7, %v101_v6  ;;  %v108_v10 = vld [vmem:[#allocation2 + $0x38] sm:$0xff]  ;;  %v105_v11 = vld [vmem:[#allocation2 + $0x20] sm:$0xff]  ;;  %v93_v29 = vand.u32 127, %v92_v28  ;;  %vm308_vm4 = vcmask 48128   ;;  %s1210_s16 = smov [#allocation10]  }
  0x4e   :  { %v107_v12 = vld [vmem:[#allocation2 + $0x30] sm:$0xff]  ;;  %v964_v13 = vpack.c.bf16 %v108_v10, %v106_v8  ;;  %v110_v14 = vld [vmem:[#allocation2 + $0x48] sm:$0xff]  ;;  %v112_v15 = vld [vmem:[#allocation2 + $0x58] sm:$0xff]  ;;  %s867_s25 = sshll.u32 %s1210_s16, 4  ;;  %s868_s25 = int_to_ptr.vmem [resolvable:$true] %s867_s25 }
  0x4f   :  { %961 = vmatprep.subr.bf16.mxu0 %v960_v5  ;;  %v966_v16 = vpack.c.bf16 %v107_v12, %v105_v11  ;;  %v968_v17 = vpack.c.bf16 %v112_v15, %v110_v14  ;;  %v109_v18 = vld [vmem:[#allocation2 + $0x40] sm:$0xff]  ;;  %v111_v19 = vld [vmem:[#allocation2 + $0x50] sm:$0xff]  ;;  %v114_v21 = vld [vmem:[#allocation2 + $0x68] sm:$0x3]  ;;  %s1168_s26 = scalar_lea.vmem %s868_s25, 128  ;;  %p1173_p5 = scmp.lt.s32.totalorder %s868_s25, %s868_s25 }
  0x50   :  { %963 = vmatpush1.bf16.msra.mxu0 %v962_v9  ;;  %v970_v20 = vpack.c.bf16 %v111_v19, %v109_v18  ;;  %v198_v22 = vld [vmem:[#allocation5 + $0x8] sm:$0xff]  ;;  %v200_v23 = vld [vmem:[#allocation5 + $0x18] sm:$0xff]  ;;  %v113_v24 = vld [vmem:[#allocation2 + $0x60] sm:$0x3]  ;;  %p1169_p4 = scmp.ne.s32.totalorder %s868_s25, %s1168_s26  ;;  %p1174_p6 = scmp.lt.s32.totalorder %s1168_s26, %s1168_s26 }
  0x51   :  { %965 = vmatprep.subr.bf16.mxu0 %v964_v13  ;;  %v972_v25 = vpack.c.bf16 %v200_v23, %v198_v22  ;;  %v1000_v26 = vld [vmem:[#allocation7 + $0x4] ss:$8 sps:$4 sm:$0xff]   ;;  %v1002_v27 = vld [vmem:[#allocation7] ss:$8 sps:$4 sm:$0xff]   ;;  %v197_v30 = vld [vmem:[#allocation5] sm:$0xff]  ;;  %v1340_v23 = vshrl.u32 %v92_v28, 7 }
  0x52   :  { %604 = vmatprep.subr.bf16.mxu1 %v1000_v26  ;;  %v199_v31 = vld [vmem:[#allocation5 + $0x10] sm:$0xff]  ;;  %v202_v32 = vld [vmem:[#allocation5 + $0x28] sm:$0xff]  ;;  %v204_v33 = vld [vmem:[#allocation5 + $0x38] sm:$0xff]  ;;  %p1175_p7 = por %p1174_p6, %p1173_p5 }
  0x53   :  { %605 = vmatpush1.bf16.msra.mxu1 %v1002_v27  ;;  %v974_v35 = vpack.c.bf16 %v199_v31, %v197_v30  ;;  %v976_v36 = vpack.c.bf16 %v204_v33, %v202_v32  ;;  %v201_v37 = vld [vmem:[#allocation5 + $0x20] sm:$0xff]  ;;  %v203_v38 = vld [vmem:[#allocation5 + $0x30] sm:$0xff]  ;;  %v206_v40 = vld [vmem:[#allocation5 + $0x48] sm:$0xff]  ;;  %v299_v26 = vsub.s32 1, %v1340_v23 }
  0x54   :  { %967 = vmatpush1.bf16.msra.mxu0 %v966_v16  ;;  %v208_v41 = vld [vmem:[#allocation5 + $0x58] sm:$0xff]  ;;  %v978_v42 = vpack.c.bf16 %v203_v38, %v201_v37  ;;  %v205_v44 = vld [vmem:[#allocation5 + $0x40] sm:$0xff]  ;;  %v207_v45 = vld [vmem:[#allocation5 + $0x50] sm:$0xff]  ;;  %p1176_p8 = pnand %p1175_p7, %p1169_p4 }
  0x55   :  { %969 = vmatprep.subr.bf16.mxu0 %v968_v17  ;;  %v980_v43 = vpack.c.bf16 %v208_v41, %v206_v40  ;;  %v982_v46 = vpack.c.bf16 %v207_v45, %v205_v44  ;;  %v290_v47 = vld [vmem:[%s1383_s4] sm:$0x77]  ;;  %v210_v48 = vld [vmem:[#allocation5 + $0x68] sm:$0x3]  ;;  %v1006_v57 = vld [vmem:[#allocation7 + $0x24] ss:$8 sps:$4 sm:$0xff]  }
  0x56   :  { %v885_v49 = vcombine.low %v290_v47, %v290_v47  ;;  %v209_v50 = vld [vmem:[#allocation5 + $0x60] sm:$0x3]  ;;  %v886_v51 = vcombine.high %v290_v47, %v290_v47  ;;  %v1003_v55 = vld [vmem:[#allocation7 + $0x14] ss:$8 sps:$4 sm:$0xff]   ;;  %v1008_v58 = vld [vmem:[#allocation7 + $0x20] ss:$8 sps:$4 sm:$0xff]  }
  0x57   :  { %v288_v52 = vld [vmem:[%s1380_s1] sm:$0xff]  ;;  %606 = vmatprep.subr.bf16.mxu1 %v1003_v55  ;;  %v1012_v61 = vld [vmem:[#allocation7 + $0x44] ss:$8 sps:$4 sm:$0xff]   ;;  %v1014_v62 = vld [vmem:[#allocation7 + $0x40] ss:$8 sps:$4 sm:$0xff]  }
  0x58   :  { %971 = vmatpush1.bf16.msra.mxu0 %v970_v20  ;;  %v314_v53 = vsel %vm312_vm3, %v885_v49, 0  ;;  %v289_v54 = vpack.c.bf16 %v288_v52, %v288_v52  ;;  %v1005_v56 = vld [vmem:[#allocation7 + $0x10] ss:$8 sps:$4 sm:$0xff]   ;;  %v1009_v59 = vld [vmem:[#allocation7 + $0x34] ss:$8 sps:$4 sm:$0xff]  }
  0x59   :  { %879 = vmatprep.subr.msk.mxu0 %vm119_vm0, %v114_v21  ;;  %607 = vmatpush1.bf16.msra.mxu1 %v1005_v56  ;;  %v1011_v60 = vld [vmem:[#allocation7 + $0x30] ss:$8 sps:$4 sm:$0xff]   ;;  %v1015_v63 = vld [vmem:[#allocation7 + $0x54] ss:$8 sps:$4 sm:$0xff]   ;;  %v1020_v2 = vld [vmem:[#allocation7 + $0x60] ss:$8 sps:$4 sm:$0xff]  }
  0x5a   :  { %608 = vmatprep.subr.bf16.mxu1 %v1006_v57  ;;  %v1021_v3 = vld [vmem:[#allocation7 + $0x74] ss:$8 sps:$4 sm:$0xff]   ;;  %v1023_v4 = vld [vmem:[#allocation7 + $0x70] ss:$8 sps:$4 sm:$0xff]   ;;  %v1024_v5 = vld [vmem:[#allocation7 + $0x84] ss:$8 sps:$4 sm:$0xff]  }
  0x5b   :  { %v1026_v6 = vld [vmem:[#allocation7 + $0x80] ss:$8 sps:$4 sm:$0xff]   ;;  %v1027_v7 = vld [vmem:[#allocation7 + $0x94] ss:$8 sps:$4 sm:$0xff]   ;;  %v1029_v8 = vld [vmem:[#allocation7 + $0x90] ss:$8 sps:$4 sm:$0xff]  }
  0x5c   :  { %880 = vmatpush1.msk.msra.mxu0 %vm119_vm0, %v113_v24  ;;  %v1030_v9 = vld [vmem:[#allocation7 + $0xa4] ss:$8 sps:$4 sm:$0xff]   ;;  %v1032_v10 = vld [vmem:[#allocation7 + $0xa0] ss:$8 sps:$4 sm:$0xff]   ;;  %v1033_v11 = vld [vmem:[#allocation7 + $0xb4] ss:$8 sps:$4 sm:$0xff]  }
  0x5d   :  { %973 = vmatprep.subr.bf16.mxu0 %v972_v25  ;;  %609 = vmatpush1.bf16.msra.mxu1 %v1008_v58  ;;  %v1035_v12 = vld [vmem:[#allocation7 + $0xb0] ss:$8 sps:$4 sm:$0xff]   ;;  %v1036_v13 = vld [vmem:[#allocation7 + $0xc4] ss:$8 sps:$4 sm:$0xff]   ;;  %v1038_v14 = vld [vmem:[#allocation7 + $0xc0] ss:$8 sps:$4 sm:$0xff]  }
  0x5e   :  { %610 = vmatprep.subr.bf16.mxu1 %v1009_v59  ;;  %v1039_v15 = vld [vmem:[#allocation7 + $0xd4] ss:$8 sps:$4 sm:$0xff]   ;;  %v1041_v16 = vld [vmem:[#allocation7 + $0xd0] ss:$8 sps:$4 sm:$0xff]   ;;  %v1042_v17 = vld [vmem:[#allocation7 + $0xe4] ss:$8 sps:$4 sm:$0xff]  }
  0x5f   :  { %v1044_v18 = vld [vmem:[#allocation7 + $0xe0] ss:$8 sps:$4 sm:$0xff]   ;;  %v1045_v19 = vld [vmem:[#allocation7 + $0xf4] ss:$8 sps:$4 sm:$0xff]   ;;  %v1047_v20 = vld [vmem:[#allocation7 + $0xf0] ss:$8 sps:$4 sm:$0xff]  }
  0x60   :  { %v295_v24 = vsub.s32 0, %v1340_v23  ;;  %v291_v25 = vld [vmem:[%s1384_s5] sm:$0x3] }
  0x61   :  { %611 = vmatpush1.bf16.msra.mxu1 %v1011_v60  ;;  %v300_v31 = vrot.slane %v291_v25, %v299_v26 }
  0x62   :  { %612 = vmatprep.subr.bf16.mxu1 %v1012_v61  ;;  %v296_v30 = vrot.slane %v291_v25, %v295_v24  ;;  %v432_v25 = vld [vmem:[%s1386_s7] sm:$0x3] }
  0x65   :  { %613 = vmatpush1.bf16.msra.mxu1 %v1014_v62 }
  0x66   :  { %614 = vmatprep.subr.bf16.mxu1 %v1015_v63 }
  0xcc   :  { %v97_v34 = vpop.permute.xlu0 %96 }
  0xcd   :  { %vm98_vm2 = vcmp.eq.s32.totalorder %v97_v34, %v93_v29 }
  0xce   :  { %v878_v39 = vsel %vm98_vm2, 1.0, %v1209_v1 }
  0xcf   :  { %881 = vmatmul.mubr.msk.f32.vlgmr.msra.gmra.mrb[0].mxu0 %vm115_vm1, %v878_v39 }
  0xd0   :  { %975 = vmatpush1.bf16.msra.mxu0 %v974_v35  ;;  %281 = vmatprep.mubr.f32.mxu0 %v1209_v1  ;;  %v1018_v1 = vld [vmem:[#allocation7 + $0x64] ss:$8 sps:$4 sm:$0xff]  }
  0xd1   :  { %977 = vmatprep.subr.bf16.mxu0 %v976_v36 }
  0xd4   :  { %979 = vmatpush1.bf16.msra.mxu0 %v978_v42 }
  0xd5   :  { %981 = vmatprep.subr.bf16.mxu0 %v980_v43 }
  0xd8   :  { %983 = vmatpush1.bf16.msra.mxu0 %v982_v46 }
  0xd9   :  { %882 = vmatprep.subr.msk.mxu0 %vm119_vm0, %v210_v48 }
  0xdc   :  { %883 = vmatpush1.msk.msra.mxu0 %vm119_vm0, %v209_v50 }
  0xdd   :  { %884 = vmatmul.mubr.msk.f32.vlgmr.msra.gmra.mrb[2].mxu0 %vm115_vm1, %v878_v39  ;;  %887 = vmatprep.subr.msk.bf16.mxu0 %vm312_vm3, %v886_v51 }
  0xde   :  { %320 = vmatpush1.bf16.msra.mxu0 %v314_v53  ;;  %351 = vmatprep.mubr.bf16.mxu0 %v1208_v0  ;;  %v1017_v0 = vld [vmem:[#allocation7 + $0x50] ss:$8 sps:$4 sm:$0xff]  }
  0xdf   :  { %615 = vmatpush1.bf16.msra.mxu1 %v1017_v0 }
  0xe0   :  { %616 = vmatprep.subr.bf16.mxu1 %v1018_v1 }
  0xe1   :  { %888 = vmatmul.mubr.msk.bf16.vlgmr.msra.gmra.mrb[4].mxu0 %vm308_vm4, %v289_v54 }
  0xe3   :  { %617 = vmatpush1.bf16.msra.mxu1 %v1020_v2 }
  0xe4   :  { %618 = vmatprep.subr.bf16.mxu1 %v1021_v3 }
  0xe7   :  { %619 = vmatpush1.bf16.msra.mxu1 %v1023_v4 }
  0xe8   :  { %620 = vmatprep.subr.bf16.mxu1 %v1024_v5 }
  0xeb   :  { %621 = vmatpush1.bf16.msra.mxu1 %v1026_v6 }
  0xec   :  { %622 = vmatprep.subr.bf16.mxu1 %v1027_v7  ;;  %v1048_v7 = vld [vmem:[#allocation8 + $0x40] sm:$0xff]  }
  0xed   :  { %938 = vmatprep.subr.bf16.mxu0 %v1048_v7 }
  0xef   :  { %623 = vmatpush1.bf16.msra.mxu1 %v1029_v8  ;;  %v1049_v8 = vld [vmem:[#allocation8] sm:$0xff]  }
  0xf0   :  { %624 = vmatprep.subr.bf16.mxu1 %v1030_v9  ;;  %v1050_v9 = vld [vmem:[#allocation8 + $0x48] sm:$0xff]   ;;  %939 = vmatpush3.bf16.msra.mxu0 %v1049_v8 }
  0xf1   :  { %940 = vmatprep.subr.bf16.mxu0 %v1050_v9 }
  0xf3   :  { %625 = vmatpush1.bf16.msra.mxu1 %v1032_v10  ;;  %v1051_v10 = vld [vmem:[#allocation8 + $0x8] sm:$0xff]  }
  0xf4   :  { %626 = vmatprep.subr.bf16.mxu1 %v1033_v11  ;;  %v1052_v11 = vld [vmem:[#allocation8 + $0x50] sm:$0xff]   ;;  %941 = vmatpush3.bf16.msra.mxu0 %v1051_v10 }
  0xf5   :  { %942 = vmatprep.subr.bf16.mxu0 %v1052_v11 }
  0xf7   :  { %627 = vmatpush1.bf16.msra.mxu1 %v1035_v12  ;;  %v1053_v12 = vld [vmem:[#allocation8 + $0x10] sm:$0xff]  }
  0xf8   :  { %628 = vmatprep.subr.bf16.mxu1 %v1036_v13  ;;  %v1054_v13 = vld [vmem:[#allocation8 + $0x58] sm:$0xff]   ;;  %943 = vmatpush3.bf16.msra.mxu0 %v1053_v12 }
  0xf9   :  { %944 = vmatprep.subr.bf16.mxu0 %v1054_v13 }
  0xfb   :  { %629 = vmatpush1.bf16.msra.mxu1 %v1038_v14  ;;  %v1055_v14 = vld [vmem:[#allocation8 + $0x18] sm:$0xff]  }
  0xfc   :  { %630 = vmatprep.subr.bf16.mxu1 %v1039_v15  ;;  %v1056_v15 = vld [vmem:[#allocation8 + $0x60] sm:$0xff]   ;;  %945 = vmatpush3.bf16.msra.mxu0 %v1055_v14 }
  0xfd   :  { %946 = vmatprep.subr.bf16.mxu0 %v1056_v15 }
  0xff   :  { %631 = vmatpush1.bf16.msra.mxu1 %v1041_v16  ;;  %v1057_v16 = vld [vmem:[#allocation8 + $0x20] sm:$0xff]  }
 0x100   :  { %632 = vmatprep.subr.bf16.mxu1 %v1042_v17  ;;  %v1058_v17 = vld [vmem:[#allocation8 + $0x68] sm:$0xff]   ;;  %947 = vmatpush3.bf16.msra.mxu0 %v1057_v16 }
 0x101   :  { %948 = vmatprep.subr.bf16.mxu0 %v1058_v17 }
 0x103   :  { %633 = vmatpush1.bf16.msra.mxu1 %v1044_v18  ;;  %v1059_v18 = vld [vmem:[#allocation8 + $0x28] sm:$0xff]  }
 0x104   :  { %634 = vmatprep.subr.bf16.mxu1 %v1045_v19  ;;  %v1060_v19 = vld [vmem:[#allocation8 + $0x70] sm:$0xff]   ;;  %949 = vmatpush3.bf16.msra.mxu0 %v1059_v18 }
 0x105   :  { %950 = vmatprep.subr.bf16.mxu0 %v1060_v19 }
 0x107   :  { %635 = vmatpush1.bf16.msra.mxu1 %v1047_v20  ;;  %v1061_v20 = vld [vmem:[#allocation8 + $0x30] sm:$0xff]  }
 0x108   :  { %951 = vmatpush3.bf16.msra.mxu0 %v1061_v20 }
 0x1a2   :  { %v192_v21 = vpop.f32.mrb[0].mxu0 }
 0x1a3   :  { %v194_v22 = vpop.f32.mrb[1].mxu0 }
 0x1b0   :  { %v1347_v27 = vpop.f32.mrb[2].mxu0 }
 0x1b1   :  { %v1349_v29 = vpop.f32.mrb[3].mxu0 }
 0x1b4   :  { %v353_v28 = vpop.f32.mrb[4].mxu0 }
 0x1b5   :  { %v354_v32 = vadd.f32 %v353_v28, %v296_v30  ;;  %v355_v33 = vpop.f32.mrb[5].mxu0  ;;  %v437_v30 = vrot.slane %v432_v25, %v295_v24 }
 0x1b6   :  { %v356_v34 = vadd.f32 %v355_v33, %v300_v31  ;;  %v357_v35 = vpop.f32.mrb[6].mxu0  ;;  %v441_v31 = vrot.slane %v432_v25, %v299_v26 }
 0x1b7   :  { %v360_v36 = vmul.f32 %v354_v32, %v192_v21  ;;  %v358_v37 = vpop.f32.mrb[7].mxu0  ;;  %v1062_v21 = vld [vmem:[#allocation8 + $0x78] sm:$0xff]  }
 0x1b8   :  { %v361_v38 = vmul.f32 %v356_v34, %v194_v22  ;;  %v1063_v22 = vld [vmem:[#allocation8 + $0x38] sm:$0xff]   ;;  %952 = vmatprep.subr.bf16.mxu0 %v1062_v21 }
 0x1b9   :  { %v368_v39 = vand.u32 2147483647, %v360_v36  ;;  %v362_v59 = vmax.f32 %v360_v36, 0.0  ;;  %vm364_vm7 = vcmp.ne.f32.partialorder %v360_v36, %v360_v36  ;;  %953 = vmatpush3.bf16.msra.mxu0 %v1063_v22 }
 0x1ba   :  { %v369_v40 = vand.u32 2147483647, %v361_v38  ;;  %v363_v62 = vmax.f32 %v361_v38, 0.0  ;;  %vm365_vm8 = vcmp.ne.f32.partialorder %v361_v38, %v361_v38 }
 0x1bb   :  { %v370_v41 = vsub.f32 0.0, %v368_v39 }
 0x1bc   :  { %v371_v42 = vsub.f32 0.0, %v369_v40 }
 0x1bd   :  { %v372_v43 = vmul.f32 1.442695, %v370_v41 }
 0x1be   :  { %v374_v44 = vmul.f32 1.442695, %v371_v42 }
 0x1bf   :  { %1064 = vpow2.f32 %v372_v43 }
 0x1c0   :  { %1066 = vpow2.f32 %v374_v44 }
 0x1c9   :  { %v1065_v45 = vpop.eup %1064 }
 0x1ca   :  { %v1067_v46 = vpop.eup %1066  ;;  %v376_v47 = vadd.f32 1.0, %v1065_v45  ;;  %v379_v49 = vmul.f32 -0.5, %v1065_v45  ;;  %v382_v53 = vand.u32 2147483647, %v1065_v45 }
 0x1cb   :  { %v385_v48 = vadd.f32 1.0, %v1067_v46  ;;  %v388_v50 = vmul.f32 -0.5, %v1067_v46  ;;  %v391_v54 = vand.u32 2147483647, %v1067_v46 }
 0x1cc   :  { %1068 = vlog2.f32 %v376_v47  ;;  %v380_v51 = vadd.f32 1.0, %v379_v49  ;;  %vm383_vm5 = vcmp.lt.f32.partialorder %v382_v53, 0.0004427343 }
 0x1cd   :  { %1070 = vlog2.f32 %v385_v48  ;;  %v389_v52 = vadd.f32 1.0, %v388_v50  ;;  %vm392_vm6 = vcmp.lt.f32.partialorder %v391_v54, 0.0004427343 }
 0x1ce   :  { %v381_v58 = vmul.f32 %v1065_v45, %v380_v51 }
 0x1cf   :  { %v390_v61 = vmul.f32 %v1067_v46, %v389_v52 }
 0x1d6   :  { %v1069_v55 = vpop.eup %1068 }
 0x1d7   :  { %v1071_v56 = vpop.eup %1070  ;;  %v378_v57 = vmul.f32 0.6931472, %v1069_v55 }
 0x1d8   :  { %v387_v60 = vmul.f32 0.6931472, %v1071_v56 }
 0x1d9   :  { %v384_v63 = vsel %vm383_vm5, %v381_v58, %v378_v57 }
 0x1da   :  { %v393_v0 = vsel %vm392_vm6, %v390_v61, %v387_v60  ;;  %v394_v1 = vadd.f32 %v384_v63, %v362_v59 }
 0x1db   :  { %v395_v2 = vadd.f32 %v393_v0, %v363_v62 }
 0x1dc   :  { %v396_v3 = vsel %vm364_vm7, %v360_v36, %v394_v1 }
 0x1dd   :  { %v397_v4 = vsel %vm365_vm8, %v361_v38, %v395_v2  ;;  %v398_v6 = vpack.c.bf16 %v396_v3, %v396_v3  ;;  %v921_v3 = vld [vmem:[%s1388_s9] ss:$0 sm:$0xff] }
 0x1de   :  { %v399_v5 = vpack.c.bf16 %v397_v4, %v397_v4 }
 0x1e0   :  { %636 = vmatprep.mubr.bf16.mxu1 %v399_v5 }
 0x1e1   :  { %637 = vmatmul.mubr.bf16.vlgmr.msra.gmra.mrb[0].mxu1 %v398_v6 }
 0x2b4   :  { %v638_v28 = vpop.f32.mrb[0].mxu1 }
 0x2b5   :  { %v639_v32 = vadd.f32 %v638_v28, %v437_v30  ;;  %v640_v33 = vpop.f32.mrb[1].mxu1 }
 0x2b6   :  { %v641_v34 = vadd.f32 %v640_v33, %v441_v31  ;;  %v642_v35 = vpop.f32.mrb[2].mxu1 }
 0x2b7   :  { %v645_v36 = vmul.f32 %v639_v32, %v1347_v27  ;;  %v643_v37 = vpop.f32.mrb[3].mxu1 }
 0x2b8   :  { %v646_v38 = vmul.f32 %v641_v34, %v1349_v29 }
 0x2b9   :  { %v653_v39 = vand.u32 2147483647, %v645_v36  ;;  %v647_v54 = vmax.f32 %v645_v36, 0.0  ;;  %vm649_vm11 = vcmp.ne.f32.partialorder %v645_v36, %v645_v36 }
 0x2ba   :  { %v654_v40 = vand.u32 2147483647, %v646_v38  ;;  %v648_v57 = vmax.f32 %v646_v38, 0.0  ;;  %vm650_vm12 = vcmp.ne.f32.partialorder %v646_v38, %v646_v38 }
 0x2bb   :  { %v655_v41 = vsub.f32 0.0, %v653_v39 }
 0x2bc   :  { %v656_v42 = vsub.f32 0.0, %v654_v40 }
 0x2bd   :  { %v657_v43 = vmul.f32 1.442695, %v655_v41 }
 0x2be   :  { %v659_v44 = vmul.f32 1.442695, %v656_v42 }
 0x2bf   :  { %1072 = vpow2.f32 %v657_v43 }
 0x2c0   :  { %1074 = vpow2.f32 %v659_v44 }
 0x2c9   :  { %v1073_v23 = vpop.eup %1072 }
 0x2ca   :  { %v1075_v24 = vpop.eup %1074  ;;  %v661_v26 = vadd.f32 1.0, %v1073_v23  ;;  %v664_v46 = vmul.f32 -0.5, %v1073_v23  ;;  %v667_v49 = vand.u32 2147483647, %v1073_v23 }
 0x2cb   :  { %v670_v45 = vadd.f32 1.0, %v1075_v24  ;;  %v673_v47 = vmul.f32 -0.5, %v1075_v24  ;;  %v676_v29 = vand.u32 2147483647, %v1075_v24 }
 0x2cc   :  { %1076 = vlog2.f32 %v661_v26  ;;  %v665_v27 = vadd.f32 1.0, %v664_v46  ;;  %vm668_vm9 = vcmp.lt.f32.partialorder %v667_v49, 0.0004427343 }
 0x2cd   :  { %1078 = vlog2.f32 %v670_v45  ;;  %v674_v48 = vadd.f32 1.0, %v673_v47  ;;  %vm677_vm10 = vcmp.lt.f32.partialorder %v676_v29, 0.0004427343 }
 0x2ce   :  { %v666_v53 = vmul.f32 %v1073_v23, %v665_v27 }
 0x2cf   :  { %v675_v56 = vmul.f32 %v1075_v24, %v674_v48 }
 0x2d6   :  { %v1077_v50 = vpop.eup %1076 }
 0x2d7   :  { %v1079_v51 = vpop.eup %1078  ;;  %v663_v52 = vmul.f32 0.6931472, %v1077_v50 }
 0x2d8   :  { %v672_v55 = vmul.f32 0.6931472, %v1079_v51 }
 0x2d9   :  { %v669_v58 = vsel %vm668_vm9, %v666_v53, %v663_v52 }
 0x2da   :  { %v678_v59 = vsel %vm677_vm10, %v675_v56, %v672_v55  ;;  %v679_v60 = vadd.f32 %v669_v58, %v647_v54 }
 0x2db   :  { %v680_v61 = vadd.f32 %v678_v59, %v648_v57 }
 0x2dc   :  { %v681_v62 = vsel %vm649_vm11, %v645_v36, %v679_v60 }
 0x2dd   :  { %v682_v63 = vsel %vm650_vm12, %v646_v38, %v680_v61  ;;  %v683_v1 = vpack.c.bf16 %v681_v62, %v681_v62 }
 0x2de   :  { %v684_v0 = vpack.c.bf16 %v682_v63, %v682_v63 }
 0x2e0   :  { %852 = vmatprep.mubr.bf16.mxu0 %v684_v0 }
 0x2e1   :  { %853 = vmatmul.mubr.bf16.vlgmr.msra.gmra.mrb[8].mxu0 %v683_v1 }
 0x3b4   :  { %v954_v2 = vpop.f32.mrb[8].mxu0 }
 0x3b5   :  { %v955_v4 = vpop.f32.mrb[9].mxu0 }
 0x3b6   :  { %v956_v5 = vadd.f32 %v955_v4, %v954_v2  ;;  %v957_v6 = vpop.f32.mrb[10].mxu0 }
 0x3b7   :  { %v958_v7 = vpop.f32.mrb[11].mxu0 }
 0x3b8   :  { %v855_v8 = vadd.f32 %v956_v5, %v921_v3 }
 0x3ba   :  { %860 = vst [vmem:[#allocation10] sm:$0xff] %v855_v8 }
 0x3bb   :  { %1179 = shalt.err (!%p1176_p8)
}
 0x3bc   :  { %s1180_s9 = scalar_lea.hbm %s1389_s10, 128 }
 0x3bd   :  { %p1181_p9 = scmp.ne.s32.totalorder %s1389_s10, %s1180_s9  ;;  %p1184_p10 = scmp.lt.u32.totalorder %s1180_s9, %s1389_s10 }
 0x3bf   :  { %p1186_p11 = pnand %p1184_p10, %p1181_p9 }
 0x3c1   :  { %1189 = shalt.err (!%p1186_p11)
}
 0x3c2   :  { %870 = dma.vmem_to_hbm [thread:$0]  %s868_s25, 128, %s1389_s10, [#allocation4]  }
 0x3c3   :  { %1196 = dma.done.wait [#allocation4], 128  }
 0x3c4   :  { %1197 = vsyncadd [#allocation4], 4294967168 }
 0x3c5   :  { %874 = vsyncpa [#allocation3], 1 }
 0x3c6   :  { %875 = vsyncpa [#allocation6], 1 }
 0x3c7   :  { %876 = vsyncpa [#allocation9], 1 }
 0x3c8   :  { %877 = vsyncpa [#allocation4], 1 }

</bundles_post_ra>
